<compile_context>
chip_gen: v7x
topology: tpu7x:2x2x1
jax: 0.10.0
libtpu: 0.0.40
codegen_flags: <defaults>
</compile_context>

<pallas_src>
import functools
import math

import jax
import jax.numpy as jnp
from jax.experimental import pallas as pl
from jax.experimental.pallas import tpu as pltpu


def _round_up(a, m):
    return -(-a // m) * m


def sage_kernel(adj_ref, h_ref, x_ref, wr_ref, b_ref, dinv_ref,
                out_ref, acc_ref, *, tk, h_resident):
    k = pl.program_id(1)

    # Hot loop (HBM-bound): 0/1 int8 adjacency tile -> bf16 (VPU cast, free
    # under the DMA), one MXU matmul against the h = x @ W slab, f32 accum.
    a = adj_ref[...].astype(jnp.bfloat16)
    if h_resident:
        start = pl.multiple_of(k * tk, tk)
        h_blk = h_ref[pl.ds(start, tk), :]     # slice of the VMEM-resident h
    else:
        h_blk = h_ref[...]                     # streamed (tk, Fp) K-slab
    contrib = jnp.dot(a, h_blk, preferred_element_type=jnp.float32)

    @pl.when(k == 0)
    def _():
        acc_ref[...] = contrib                 # write-direct, no zero-init pass

    @pl.when(k > 0)
    def _():
        acc_ref[...] += contrib

    @pl.when(k == pl.num_programs(1) - 1)
    def _():
        # Epilogue once per row tile: exact f32 1/deg scaling (mean
        # aggregation), root/self term, bias, lane-dense f32 store.
        root = jnp.dot(x_ref[...], wr_ref[...],
                       preferred_element_type=jnp.float32)
        out_ref[...] = (dinv_ref[...] * acc_ref[...] + root
                        + b_ref[...]).astype(out_ref.dtype)


def prepare_graph(adj):
    """One-time per-graph prep: 0/1 int8 adjacency + f32 inverse degree.

    Reuse the result across all SAGE layers / training steps -- these are the
    only full passes over the dense N^2 adjacency outside the kernel.
    Matches SparseTensor.matmul(reduce='mean') for a binary adjacency
    (rows with no neighbors aggregate to zero).
    """
    deg = jnp.sum(adj.astype(jnp.float32), axis=1, keepdims=True)
    deg_inv = (1.0 / jnp.maximum(deg, 1.0)).astype(jnp.float32)
    adj_i8 = (adj > 0).astype(jnp.int8)
    return adj_i8, deg_inv


def l_sage_forward(adj_i8, deg_inv, x, weight, root_weight, bias,
                   *, tm=512, tk=1024, h_resident=None):
    """out = D^{-1}(A @ x @ W) + x @ W_root + b   (f32 result, shape (N, Fout))."""
    N = adj_i8.shape[0]
    Fin, Fout = weight.shape
    f32, bf16 = jnp.float32, jnp.bfloat16

    # Lane-pad the output feature dim to a multiple of 128 (dense stores,
    # full MXU columns); sliced off at the end.
    Fp = _round_up(Fout, 128)

    # Clamp tiles for small graphs (kept multiples of 128 for lane/MXU
    # alignment), then pad rows and columns of the adjacency *independently*.
    n128 = _round_up(N, 128)
    tm = min(tm, n128)
    tk = min(tk, n128)
    Mp = _round_up(N, tm)
    # Keep >= 2 row tiles so the "parallel" row axis can actually be sharded
    # across the two TensorCores on v7x megacore parts.
    if Mp // tm < 2 and tm > 128:
        tm = max(128, (tm // 2) // 128 * 128)
        Mp = _round_up(N, tm)
    Kp = _round_up(N, tk)

    # h = x @ W hoisted out of the kernel grid loop: computed exactly once.
    w_p = jnp.pad(weight.astype(f32), ((0, 0), (0, Fp - Fout)))
    h = jnp.dot(x.astype(f32), w_p, preferred_element_type=f32)
    h_p = jnp.pad(h, ((0, Kp - N), (0, 0))).astype(bf16)

    # Decide whether h can live resident in VMEM (single DMA) -- budget it
    # conservatively against the v7x 64 MiB physical / 32 MiB scoped default.
    if h_resident is None:
        h_resident = 2 * Kp * Fp * 2 <= (12 << 20)

    adj_p = jnp.pad(adj_i8, ((0, Mp - N), (0, Kp - N)))                # int8 0/1
    dinv_p = jnp.pad(deg_inv.astype(f32), ((0, Mp - N), (0, 0)))       # f32 (Mp,1)
    x_p = jnp.pad(x.astype(f32), ((0, Mp - N), (0, 0))).astype(bf16)
    wr_p = jnp.pad(root_weight.astype(f32), ((0, 0), (0, Fp - Fout))).astype(bf16)
    b_p = jnp.pad(bias.astype(f32).reshape(1, Fout), ((0, 0), (0, Fp - Fout)))

    grid = (Mp // tm, Kp // tk)

    if h_resident:
        h_spec = pl.BlockSpec((Kp, Fp), lambda i, k: (0, 0))   # constant index -> one DMA
        h_hbm_bytes = Kp * Fp * 2
    else:
        h_spec = pl.BlockSpec((tk, Fp), lambda i, k: (k, 0))   # streamed K-slab
        h_hbm_bytes = (Mp // tm) * Kp * Fp * 2

    # Explicit VMEM budget (scoped default is only 16/32 MiB of the part).
    vmem_est = (
        3 * tm * tk * 1                               # adj tiles (buffered)
        + (2 if not h_resident else 2) * (h_spec.block_shape[0] * Fp * 2)
        + 2 * tm * Fin * 2 + 2 * Fin * Fp * 2 + 2 * Fp * 4 + 2 * tm * 4
        + 2 * tm * Fp * 4                             # out tiles
        + tm * Fp * 4                                 # f32 accumulator
    )
    vmem_limit = min(int(vmem_est * 1.5) + (4 << 20), 48 << 20)

    flops = 2 * Mp * Kp * Fp + 2 * Mp * Fin * Fp
    bytes_accessed = (Mp * Kp * 1 + h_hbm_bytes + Mp * Fin * 2
                      + Fin * Fp * 2 + Fp * 4 + Mp * 4 + Mp * Fp * 4)

    kernel = functools.partial(sage_kernel, tk=tk, h_resident=h_resident)

    out_p = pl.pallas_call(
        kernel,
        out_shape=jax.ShapeDtypeStruct((Mp, Fp), f32),
        grid_spec=pltpu.PrefetchScalarGridSpec(
            num_scalar_prefetch=0,
            grid=grid,
            in_specs=[
                # On v5e, add pipeline_mode=pl.Buffered(3) to this adjacency
                # spec to deepen DMA buffering on the low-bandwidth HBM.
                pl.BlockSpec((tm, tk), lambda i, k: (i, k)),    # A 0/1 int8 tile
                h_spec,                                         # h = x @ W
                pl.BlockSpec((tm, Fin), lambda i, k: (i, 0)),   # x row tile
                pl.BlockSpec((Fin, Fp), lambda i, k: (0, 0)),   # W_root (full)
                pl.BlockSpec((1, Fp), lambda i, k: (0, 0)),     # bias
                pl.BlockSpec((tm, 1), lambda i, k: (i, 0)),     # deg_inv column
            ],
            out_specs=pl.BlockSpec((tm, Fp), lambda i, k: (i, 0)),
            scratch_shapes=[pltpu.VMEM((tm, Fp), f32)],         # f32 accumulator
        ),
        compiler_params=pltpu.CompilerParams(
            # Row axis parallel (megacore / v7x 2-TC sharding); K is the
            # reduction -> arbitrary and last.
            dimension_semantics=("parallel", "arbitrary"),
            vmem_limit_bytes=vmem_limit,
        ),
        cost_estimate=pl.CostEstimate(
            flops=flops, transcendentals=0, bytes_accessed=bytes_accessed
        ),
    )(adj_p, h_p, x_p, wr_p, b_p, dinv_p)

    # TODO(synk): for real clustered graphs, nonzero-tile metadata +
    # PrefetchScalarGridSpec(num_scalar_prefetch>0) could skip all-zero
    # adjacency tiles; not applicable to uniformly-random demo graphs.
    return out_p[:N, :Fout]


def glorot(key, shape):
    fan_in, fan_out = shape
    a = math.sqrt(6.0 / (fan_in + fan_out))
    return jax.random.uniform(key, shape, jnp.float32, minval=-a, maxval=a)


if __name__ == "__main__":
    N, Fin, Fout = 200, 64, 40   # small: exercises row padding (200->256)
                                 # and lane padding (40->128)

    key = jax.random.PRNGKey(0)
    k_adj, k_x, k_w, k_wr = jax.random.split(key, 4)

    # Random undirected graph (symmetric binary adjacency).
    upper = (jax.random.uniform(k_adj, (N, N)) < 0.05).astype(jnp.float32)
    upper = jnp.triu(upper, 1)
    adj = jnp.maximum(upper, upper.T)

    # One-time graph prep, reused across layers / calls.
    adj_i8, deg_inv = prepare_graph(adj)

    x = jax.random.normal(k_x, (N, Fin), dtype=jnp.float32)
    weight = glorot(k_w, (Fin, Fout))
    root_weight = glorot(k_wr, (Fin, Fout))
    bias = jnp.zeros((Fout,), dtype=jnp.float32)

    # Pure-JAX f32 reference with the PyTorch operand ordering.
    deg = jnp.sum(adj, axis=1, keepdims=True)
    adj_mean = adj / jnp.maximum(deg, 1.0)
    ref = (adj_mean @ x) @ weight + x @ root_weight + bias

    # 1) default tiles -> VMEM-resident h path (and >=2 row tiles for v7x).
    out_res = l_sage_forward(adj_i8, deg_inv, x, weight, root_weight, bias)
    out_res = jax.block_until_ready(out_res)
    assert out_res.shape == (N, Fout)
    assert jnp.allclose(out_res, ref, atol=5e-2, rtol=5e-2), "resident-h mismatch"

    # 2) small tiles, forced K-slab streaming -> exercises the 2x2 grid and
    #    the K-accumulation path.
    out_str = l_sage_forward(adj_i8, deg_inv, x, weight, root_weight, bias,
                             tm=128, tk=128, h_resident=False)
    out_str = jax.block_until_ready(out_str)
    assert jnp.allclose(out_str, ref, atol=5e-2, rtol=5e-2), "streamed-h mismatch"

    print("KERNEL_OK")
</pallas_src>

<mosaic_0001>
module attributes {stable_mosaic.version = 11 : i64} {
  func.func @sage_kernel(%arg0: i32, %arg1: i32, %arg2: memref<128x256xi8, #tpu.memory_space<vmem>>, %arg3: memref<256x128xbf16, #tpu.memory_space<vmem>>, %arg4: memref<128x64xbf16, #tpu.memory_space<vmem>>, %arg5: memref<64x128xbf16, #tpu.memory_space<vmem>>, %arg6: memref<1x128xf32, #tpu.memory_space<vmem>>, %arg7: memref<128x1xf32, #tpu.memory_space<vmem>>, %arg8: memref<128x128xf32, #tpu.memory_space<vmem>>, %arg9: memref<128x128xf32, #tpu.memory_space<vmem>>) attributes {dimension_semantics = [#tpu.dimension_semantics<parallel>, #tpu.dimension_semantics<arbitrary>], iteration_bounds = array<i64: 2, 1>, scalar_prefetch = 0 : i64, scratch_operands = 1 : i64, tpu.core_type = #tpu.core_type<tc>, window_params = [{transform_indices = @transform_0, window_bounds = array<i64: 128, 256>}, {pipeline_mode = #tpu.pipeline_mode<synchronous>, transform_indices = @transform_1, window_bounds = array<i64: 256, 128>}, {transform_indices = @transform_2, window_bounds = array<i64: 128, 64>}, {pipeline_mode = #tpu.pipeline_mode<synchronous>, transform_indices = @transform_3, window_bounds = array<i64: 64, 128>}, {pipeline_mode = #tpu.pipeline_mode<synchronous>, transform_indices = @transform_4, window_bounds = array<i64: 1, 128>}, {transform_indices = @transform_5, window_bounds = array<i64: 128, 1>}, {transform_indices = @transform_6, window_bounds = array<i64: 128, 128>}]} {
    %c0 = arith.constant 0 : index
    %c0_0 = arith.constant 0 : index
    %0 = vector.load %arg2[%c0, %c0_0] : memref<128x256xi8, #tpu.memory_space<vmem>>, vector<128x256xi8>
    %1 = arith.sitofp %0 : vector<128x256xi8> to vector<128x256xbf16>
    %c256_i32 = arith.constant 256 : i32
    %2 = arith.muli %arg1, %c256_i32 : i32
    %3 = tpu.assume_multiple %2, 256 : i32
    %4 = arith.index_cast %3 : i32 to index
    %c0_1 = arith.constant 0 : index
    %5 = vector.load %arg3[%4, %c0_1] : memref<256x128xbf16, #tpu.memory_space<vmem>>, vector<256x128xbf16>
    %cst = arith.constant dense<0.000000e+00> : vector<128x128xf32>
    %6 = tpu.matmul %1, %5, %cst {dimension_numbers = #tpu.dot_dimension_numbers<[1], [0], [0], [1], [0, 0, 1, 1], [], []>} : vector<128x256xbf16>, vector<256x128xbf16>, vector<128x128xf32> -> vector<128x128xf32>
    %c0_i32 = arith.constant 0 : i32
    %7 = arith.cmpi eq, %arg1, %c0_i32 : i32
    %8 = arith.extui %7 : i1 to i32
    %c0_i32_2 = arith.constant 0 : i32
    %9 = arith.cmpi ne, %8, %c0_i32_2 : i32
    scf.if %9 {
      %c0_7 = arith.constant 0 : index
      %c0_8 = arith.constant 0 : index
      %16 = vector.load %arg9[%c0_7, %c0_8] : memref<128x128xf32, #tpu.memory_space<vmem>>, vector<128x128xf32>
      tpu.vector_store %arg9[%c0_7, %c0_8], %6 {strides = array<i32>} : memref<128x128xf32, #tpu.memory_space<vmem>>, vector<128x128xf32>,
    } else {
    }
    %c0_i32_3 = arith.constant 0 : i32
    %10 = arith.cmpi sgt, %arg1, %c0_i32_3 : i32
    %11 = arith.extui %10 : i1 to i32
    %c0_i32_4 = arith.constant 0 : i32
    %12 = arith.cmpi ne, %11, %c0_i32_4 : i32
    scf.if %12 {
      %c0_7 = arith.constant 0 : index
      %c0_8 = arith.constant 0 : index
      %16 = vector.load %arg9[%c0_7, %c0_8] : memref<128x128xf32, #tpu.memory_space<vmem>>, vector<128x128xf32>
      %17 = arith.addf %16, %6 : vector<128x128xf32>
      %c0_9 = arith.constant 0 : index
      %c0_10 = arith.constant 0 : index
      %18 = vector.load %arg9[%c0_9, %c0_10] : memref<128x128xf32, #tpu.memory_space<vmem>>, vector<128x128xf32>
      tpu.vector_store %arg9[%c0_9, %c0_10], %17 {strides = array<i32>} : memref<128x128xf32, #tpu.memory_space<vmem>>, vector<128x128xf32>,
    } else {
    }
    %c0_i32_5 = arith.constant 0 : i32
    %13 = arith.cmpi eq, %arg1, %c0_i32_5 : i32
    %14 = arith.extui %13 : i1 to i32
    %c0_i32_6 = arith.constant 0 : i32
    %15 = arith.cmpi ne, %14, %c0_i32_6 : i32
    scf.if %15 {
      %c0_7 = arith.constant 0 : index
      %c0_8 = arith.constant 0 : index
      %16 = vector.load %arg4[%c0_7, %c0_8] : memref<128x64xbf16, #tpu.memory_space<vmem>>, vector<128x64xbf16>
      %c0_9 = arith.constant 0 : index
      %c0_10 = arith.constant 0 : index
      %17 = vector.load %arg5[%c0_9, %c0_10] : memref<64x128xbf16, #tpu.memory_space<vmem>>, vector<64x128xbf16>
      %cst_11 = arith.constant dense<0.000000e+00> : vector<128x128xf32>
      %18 = tpu.matmul %16, %17, %cst_11 {dimension_numbers = #tpu.dot_dimension_numbers<[1], [0], [0], [1], [0, 0, 1, 1], [], []>} : vector<128x64xbf16>, vector<64x128xbf16>, vector<128x128xf32> -> vector<128x128xf32>
      %c0_12 = arith.constant 0 : index
      %c0_13 = arith.constant 0 : index
      %19 = vector.load %arg7[%c0_12, %c0_13] : memref<128x1xf32, #tpu.memory_space<vmem>>, vector<128x1xf32>
      %c0_14 = arith.constant 0 : index
      %c0_15 = arith.constant 0 : index
      %20 = vector.load %arg9[%c0_14, %c0_15] : memref<128x128xf32, #tpu.memory_space<vmem>>, vector<128x128xf32>
      %21 = vector.broadcast %19 : vector<128x1xf32> to vector<128x128xf32>
      %22 = arith.mulf %21, %20 : vector<128x128xf32>
      %23 = arith.addf %22, %18 : vector<128x128xf32>
      %c0_16 = arith.constant 0 : index
      %c0_17 = arith.constant 0 : index
      %24 = vector.load %arg6[%c0_16, %c0_17] : memref<1x128xf32, #tpu.memory_space<vmem>>, vector<1x128xf32>
      %25 = vector.broadcast %24 : vector<1x128xf32> to vector<128x128xf32>
      %26 = arith.addf %23, %25 : vector<128x128xf32>
      %c0_18 = arith.constant 0 : index
      %c0_19 = arith.constant 0 : index
      %27 = vector.load %arg8[%c0_18, %c0_19] : memref<128x128xf32, #tpu.memory_space<vmem>>, vector<128x128xf32>
      tpu.vector_store %arg8[%c0_18, %c0_19], %26 {strides = array<i32>} : memref<128x128xf32, #tpu.memory_space<vmem>>, vector<128x128xf32>,
    } else {
    }
    return
  }
  func.func @transform_0(%arg0: i32, %arg1: i32) -> (i32, i32) {
    %c0_i32 = arith.constant 0 : i32
    return %arg0, %arg1 : i32, i32
  }
  func.func @transform_1(%arg0: i32, %arg1: i32) -> (i32, i32) {
    %c0_i32 = arith.constant 0 : i32
    %c0_i32_0 = arith.constant 0 : i32
    %c0_i32_1 = arith.constant 0 : i32
    return %c0_i32, %c0_i32_0 : i32, i32
  }
  func.func @transform_2(%arg0: i32, %arg1: i32) -> (i32, i32) {
    %c0_i32 = arith.constant 0 : i32
    %c0_i32_0 = arith.constant 0 : i32
    return %arg0, %c0_i32 : i32, i32
  }
  func.func @transform_3(%arg0: i32, %arg1: i32) -> (i32, i32) {
    %c0_i32 = arith.constant 0 : i32
    %c0_i32_0 = arith.constant 0 : i32
    %c0_i32_1 = arith.constant 0 : i32
    return %c0_i32, %c0_i32_0 : i32, i32
  }
  func.func @transform_4(%arg0: i32, %arg1: i32) -> (i32, i32) {
    %c0_i32 = arith.constant 0 : i32
    %c0_i32_0 = arith.constant 0 : i32
    %c0_i32_1 = arith.constant 0 : i32
    return %c0_i32, %c0_i32_0 : i32, i32
  }
  func.func @transform_5(%arg0: i32, %arg1: i32) -> (i32, i32) {
    %c0_i32 = arith.constant 0 : i32
    %c0_i32_0 = arith.constant 0 : i32
    return %arg0, %c0_i32 : i32, i32
  }
  func.func @transform_6(%arg0: i32, %arg1: i32) -> (i32, i32) {
    %c0_i32 = arith.constant 0 : i32
    %c0_i32_0 = arith.constant 0 : i32
    return %arg0, %c0_i32 : i32, i32
  }
}

</mosaic_0001>

<bundles_post_ra>
// kernel: tpu_custom_call.1
= control target key start
LH: loop header
LB: loop body
LE: loop exit
PB: predicated region body
PF: predicated region fallthrough
CT: control target
= control target key end

     0   :  { %11 = vsyncpa [#allocation4], 0  ;;  %s1855_s0 = inlined_call_operand.vmem [shape: s8[256,256], index: 0, kind: input, shape index: {}]   ;;  %s1856_s1 = inlined_call_operand.vmem [shape: bf16[256,128], index: 1, kind: input, shape index: {}]   ;;  %s1857_s2 = inlined_call_operand.vmem [shape: bf16[256,64], index: 2, kind: input, shape index: {}]   ;;  %s1858_s3 = inlined_call_operand.vmem [shape: bf16[64,128], index: 3, kind: input, shape index: {}]   ;;  %s1859_s4 = inlined_call_operand.vmem [shape: f32[1,128], index: 4, kind: input, shape index: {}]   ;;  %s1860_s5 = inlined_call_operand.vmem [shape: f32[256,1], index: 5, kind: input, shape index: {}]   ;;  %s1861_s6 = inlined_call_operand.hbm [shape: f32[256,128], index: 6, kind: output, shape index: {}]  }
   0x1   :  { %13 = vsyncpa [#allocation4 + $0x1], 0  ;;  %s1547_s21 = smov 0   ;;  %s1549_s22 = smov 0  }
   0x2   :  { %s1551_s23 = smov 0   ;;  %s1553_s24 = smov 0  }
   0x3   :  { %s1555_s25 = smov 0   ;;  %s1557_s26 = smov 0  }
   0x4 LB: > { %s1167_s27 = sadd.s32 4294967295, %s1506_s26   ;;  %s1168_s28 = sadd.s32 4294967294, %s1506_s26   ;;  %s1506_s26 = sphi %s1557_s26, %s19_s26   ;;  %s1502_s25 = sphi %s1555_s25, %s1868_s25   ;;  %s1498_s24 = sphi %s1553_s24, %s1867_s24   ;;  %s1494_s23 = sphi %s1551_s23, %s1866_s23   ;;  %s1490_s22 = sphi %s1549_s22, %s1865_s22   ;;  %s1486_s21 = sphi %s1547_s21, %s1864_s21  }
   0x5   : > { %s31_s29 = sadd.s32 1, %s1502_s25  ;;  %s181_s30 = sadd.s32 1, %s1494_s23 }
   0x6   : > { %p33_p0 = scmp.ge.s32.totalorder %s31_s29, 2  ;;  %p191_p1 = scmp.ne.s32.totalorder %s1494_s23, %s1490_s22 }
   0x7   : > { %p192_p2 = scmp.eq.s32.totalorder %s1167_s27, 1  ;;  %p197_p3 = scmp.ne.s32.totalorder %s1490_s22, %s1486_s21 }
   0x8   : > { %s1870_s29 = smov (%p33_p0, %s31_s29), 0  ;;  %p198_p5 = scmp.eq.s32.totalorder %s1168_s28, 1 }
   0x9   : > { %p1587_p4 = por %p192_p2, %p191_p1  ;;  %s178_s8 = ssub.s32 %s1502_s25, %s1870_s29 }
   0xa   : > { %p1171_p6 = scmp.ge.s32.totalorder %s1506_s26, 1  ;;  %p179_p7 = scmp.eq.s32.totalorder %s178_s8, 0 }
   0xb   : > { %p1594_p8 = por %p198_p5, %p197_p3  ;;  %p258_p9 = scmp.lt.s32.totalorder %s1506_s26, 3 }
   0xc   : > { %s1600_s10 = scalar_select %p179_p7, %s1494_s23, %s181_s30  }
   0xd   : > { %p259_p10 = pnand %p1171_p6, %p258_p9 }
   0xe   : > { %v1400_v0 = vld [vmem:[%s1856_s1 + $0x40] sm:$0xff] (!%p259_p10)   ;;  %s1173_s13 = sshll.u32 (!%p259_p10), %s1498_s24, 2  ;;  %v1402_v2 = vld [vmem:[%s1856_s1 + $0x48] sm:$0xff] (!%p259_p10)   ;;  %v1404_v4 = vld [vmem:[%s1856_s1 + $0x50] sm:$0xff] (!%p259_p10)   ;;  %s1176_s28 = sshll.u32 (!%p259_p10), %s1498_s24, 4  ;;  %v1508_v7 = vmov (!%p259_p10), 0  }
   0xf   : > { %262 = sbr.rel (%p259_p10) target bundleno = 325 (0x145), region = 44  ;;  %v1401_v1 = vld [vmem:[%s1856_s1] sm:$0xff] (!%p259_p10)   ;;  %p305_p11 = scmp.lt.s32.totalorder (!%p259_p10), %s1173_s13, 7  ;;  %1224 = vmatprep.subr.bf16.mxu0 (!%p259_p10), %v1400_v0  ;;  %1324 = vmatprep.subr.bf16.mxu1 (!%p259_p10), %v1400_v0  ;;  %v1403_v3 = vld [vmem:[%s1856_s1 + $0x8] sm:$0xff] (!%p259_p10)   ;;  %v1405_v5 = vld [vmem:[%s1856_s1 + $0x10] sm:$0xff] (!%p259_p10)   ;;  %vm746_vm0 = vcmask (!%p259_p10), 523264  }
  0x10   : > { %1225 = vmatpush3.bf16.msra.mxu0 (!%p259_p10), %v1401_v1  ;;  %1332 = vmatpush3.bf16.msra.mxu1 (!%p259_p10), %v1401_v1  ;;  %v1406_v6 = vld [vmem:[%s1856_s1 + $0x58] sm:$0xff] (!%p259_p10)   ;;  %p316_p12 = scmp.lt.s32.totalorder (!%p259_p10), %s1176_s28, 31  ;;  %v1408_v9 = vld [vmem:[%s1856_s1 + $0x60] sm:$0xff] (!%p259_p10)   ;;  %v1410_v11 = vld [vmem:[%s1856_s1 + $0x68] sm:$0xff] (!%p259_p10)   ;;  %s1509_s11 = smov (!%p259_p10), [#allocation3]  }
  0x11   : > { %1226 = vmatprep.subr.bf16.mxu0 (!%p259_p10), %v1402_v2  ;;  %1325 = vmatprep.subr.bf16.mxu1 (!%p259_p10), %v1402_v2  ;;  %v1407_v8 = vld [vmem:[%s1856_s1 + $0x18] sm:$0xff] (!%p259_p10)   ;;  %v1409_v10 = vld [vmem:[%s1856_s1 + $0x20] sm:$0xff] (!%p259_p10)   ;;  %v1411_v16 = vld [vmem:[%s1856_s1 + $0x28] sm:$0xff] (!%p259_p10)  }
  0x12   : > { %1399 = vset.pattern.permute.xlu1 (!%p259_p10), %v1508_v7  ;;  %1398 = vset.pattern.permute.xlu0 (!%p259_p10), %v1508_v7  ;;  %v1412_v17 = vld [vmem:[%s1856_s1 + $0x70] sm:$0xff] (!%p259_p10)   ;;  %v1414_v19 = vld [vmem:[%s1856_s1 + $0x78] sm:$0xff] (!%p259_p10)   ;;  %v1416_v23 = vld [vmem:[%s1858_s3] sm:$0xff] (!%p259_p10)  }
  0x13   : > { %v1413_v18 = vld [vmem:[%s1856_s1 + $0x30] sm:$0xff] (!%p259_p10)   ;;  %v1415_v20 = vld [vmem:[%s1856_s1 + $0x38] sm:$0xff] (!%p259_p10)   ;;  %v1417_v30 = vld [vmem:[%s1858_s3 + $0x8] sm:$0xff] (!%p259_p10)  }
  0x14   : > { %1227 = vmatpush3.bf16.msra.mxu0 (!%p259_p10), %v1403_v3  ;;  %1333 = vmatpush3.bf16.msra.mxu1 (!%p259_p10), %v1403_v3  ;;  %v1418_v33 = vld [vmem:[%s1858_s3 + $0x10] sm:$0xff] (!%p259_p10)   ;;  %v1419_v40 = vld [vmem:[%s1858_s3 + $0x18] sm:$0xff] (!%p259_p10)  }
  0x15   : > { %1228 = vmatprep.subr.bf16.mxu0 (!%p259_p10), %v1404_v4  ;;  %1326 = vmatprep.subr.bf16.mxu1 (!%p259_p10), %v1404_v4 }
  0x16   : > { %s1872_s13 = smov (!%p305_p11, %s1173_s13), 7  ;;  %s1874_s28 = smov (!%p316_p12, %s1176_s28), 31 }
  0x17   : > { %s1222_s14 = sshll.u32 %s1872_s13, 4  ;;  %s1177_s12 = sshll.u32 %s1874_s28, 2 }
  0x18   : > { %1229 = vmatpush3.bf16.msra.mxu0 %v1405_v5  ;;  %1334 = vmatpush3.bf16.msra.mxu1 %v1405_v5  ;;  %s1634_s13 = scalar_lea.vmem %s1855_s0, %s1222_s14  ;;  %s1656_s20 = scalar_lea.vmem %s1857_s2, %s1177_s12 }
  0x19   : > { %1230 = vmatprep.subr.bf16.mxu0 %v1406_v6  ;;  %1327 = vmatprep.subr.bf16.mxu1 %v1406_v6  ;;  %v330_v12 = vld [vmem:[%s1634_s13 + $0x8] sm:$0xff]  ;;  %v336_v13 = vld [vmem:[%s1634_s13 + $0x38] sm:$0xff]  ;;  %s1179_s14 = sshll.u32 %s1874_s28, 3  ;;  %v329_v21 = vld [vmem:[%s1634_s13] sm:$0xff] }
  0x1a   : > { %v338_v14 = vunpack.c.l.s8.bf16 %v330_v12  ;;  %v350_v15 = vunpack.c.l.s8.bf16 %v336_v13  ;;  %v335_v22 = vld [vmem:[%s1634_s13 + $0x30] sm:$0xff]  ;;  %s1673_s18 = scalar_lea.vmem %s1860_s5, %s1179_s14  ;;  %v337_v24 = vunpack.c.l.s8.bf16 %v329_v21  ;;  %v340_v27 = vunpack.c.h.s8.bf16 %v330_v12  ;;  %v332_v34 = vld [vmem:[%s1634_s13 + $0x18] sm:$0xff]  ;;  %v1420_v41 = vld [vmem:[%s1656_s20] sm:$0xff]   ;;  %s1432_s14 = sshll.u32 %s1509_s11, 4  ;;  %s1433_s14 = int_to_ptr.vmem [resolvable:$false] %s1432_s14 }
  0x1b   : > { %v349_v25 = vunpack.c.l.s8.bf16 %v335_v22  ;;  %v870_v26 = vld [vmem:[%s1673_s18 + $0x10] sm:$0xff]  ;;  %v868_v28 = vld [vmem:[%s1673_s18] sm:$0xff]  ;;  %v352_v29 = vunpack.c.h.s8.bf16 %v336_v13  ;;  %v871_v31 = vld [vmem:[%s1673_s18 + $0x18] sm:$0xff]  ;;  %v339_v35 = vunpack.c.h.s8.bf16 %v329_v21  ;;  %v351_v36 = vunpack.c.h.s8.bf16 %v335_v22  ;;  %s1434_s15 = scalar_lea.vmem %s1433_s14, 4096 }
  0x1c   : > { %1231 = vmatpush3.bf16.msra.mxu0 %v1407_v8  ;;  %1335 = vmatpush3.bf16.msra.mxu1 %v1407_v8  ;;  %v869_v32 = vld [vmem:[%s1673_s18 + $0x8] sm:$0xff]  ;;  %v872_v38 = vld [vmem:[%s1673_s18 + $0x20] sm:$0xff]  ;;  %v342_v39 = vunpack.c.l.s8.bf16 %v332_v34  ;;  %v875_v42 = vld [vmem:[%s1673_s18 + $0x38] sm:$0xff]  ;;  %v344_v49 = vunpack.c.h.s8.bf16 %v332_v34 }
  0x1d   : > { %1232 = vmatprep.subr.bf16.mxu0 %v1408_v9  ;;  %1328 = vmatprep.subr.bf16.mxu1 %v1408_v9  ;;  %v873_v37 = vld [vmem:[%s1673_s18 + $0x28] sm:$0xff]  ;;  %v874_v43 = vld [vmem:[%s1673_s18 + $0x30] sm:$0xff]  ;;  %v876_v48 = vld [vmem:[%s1673_s18 + $0x40] sm:$0xff] }
  0x1e   : > { %518 = vmatprep.mubr.bf16.mxu0 %v338_v14  ;;  %566 = vmatprep.mubr.bf16.mxu1 %v350_v15  ;;  %v331_v44 = vld [vmem:[%s1634_s13 + $0x10] sm:$0xff]  ;;  %v1421_v46 = vld [vmem:[%s1656_s20 + $0x8] sm:$0xff]   ;;  %v879_v51 = vld [vmem:[%s1673_s18 + $0x58] sm:$0xff] }
  0x1f   : > { %912 = vperm.xlu1 %1399, %v870_v26   ;;  %902 = vperm.xlu0 %1398, %v868_v28   ;;  %v341_v45 = vunpack.c.l.s8.bf16 %v331_v44  ;;  %v877_v47 = vld [vmem:[%s1673_s18 + $0x48] sm:$0xff]  ;;  %v1422_v50 = vld [vmem:[%s1656_s20 + $0x10] sm:$0xff]   ;;  %v343_v54 = vunpack.c.h.s8.bf16 %v331_v44  ;;  %v1423_v55 = vld [vmem:[%s1656_s20 + $0x18] sm:$0xff]  }
  0x20   : > { %1233 = vmatpush3.bf16.msra.mxu0 %v1409_v10  ;;  %1336 = vmatpush3.bf16.msra.mxu1 %v1409_v10  ;;  %v878_v52 = vld [vmem:[%s1673_s18 + $0x50] sm:$0xff]  ;;  %v334_v53 = vld [vmem:[%s1634_s13 + $0x28] sm:$0xff]  ;;  %v880_v57 = vld [vmem:[%s1673_s18 + $0x60] sm:$0xff] }
  0x21   : > { %1234 = vmatprep.subr.bf16.mxu0 %v1410_v11  ;;  %1329 = vmatprep.subr.bf16.mxu1 %v1410_v11  ;;  %v881_v56 = vld [vmem:[%s1673_s18 + $0x68] sm:$0xff]  ;;  %v346_v58 = vunpack.c.l.s8.bf16 %v334_v53  ;;  %v1424_v59 = vld [vmem:[%s1656_s20 + $0x20] sm:$0xff]   ;;  %v883_v60 = vld [vmem:[%s1673_s18 + $0x78] sm:$0xff]  ;;  %v348_v1 = vunpack.c.h.s8.bf16 %v334_v53 }
  0x22   : > { %v882_v61 = vld [vmem:[%s1673_s18 + $0x70] sm:$0xff]  ;;  %v333_v62 = vld [vmem:[%s1634_s13 + $0x20] sm:$0xff]  ;;  %v1425_v0 = vld [vmem:[%s1656_s20 + $0x28] sm:$0xff]   ;;  %s300_s13 = sand.u32 1, %s1490_s22   ;;  %s1223_s18 = sshll.u32 %s1498_s24, 11 }
  0x23   : > { %917 = vperm.xlu1 %1399, %v871_v31   ;;  %907 = vperm.xlu0 %1398, %v869_v32   ;;  %v345_v63 = vunpack.c.l.s8.bf16 %v333_v62  ;;  %v1426_v2 = vld [vmem:[%s1656_s20 + $0x30] sm:$0xff]   ;;  %v347_v3 = vunpack.c.h.s8.bf16 %v333_v62  ;;  %v1427_v4 = vld [vmem:[%s1656_s20 + $0x38] sm:$0xff]   ;;  %s1172_s20 = sshll.u32 %s300_s13, 7  ;;  %s1800_s30 = scalar_lea.hbm %s1861_s6, %s1223_s18 }
  0x24   : > { %1235 = vmatpush3.bf16.msra.mxu0 %v1411_v16  ;;  %1337 = vmatpush3.bf16.msra.mxu1 %v1411_v16  ;;  %s1751_s17 = scalar_lea.vmem [#allocation3], %s1172_s20  ;;  %s1809_s24 = scalar_lea.sflag [#allocation4], %s300_s13 }
  0x25   : > { %1236 = vmatprep.subr.bf16.mxu0 %v1412_v17  ;;  %1330 = vmatprep.subr.bf16.mxu1 %v1412_v17  ;;  %s1065_s19 = sshll.u32 %s1751_s17, 4  ;;  %s1802_s19 = int_to_ptr.vmem [resolvable:$true] %s1065_s19 }
  0x26   : > { %s1428_s8 = scalar_lea.vmem %s1802_s19, 2048  ;;  %p1435_p2 = scmp.lt.s32.totalorder %s1802_s19, %s1433_s14 }
  0x27   : > { %927 = vperm.xlu1 %1399, %v873_v37   ;;  %922 = vperm.xlu0 %1398, %v872_v38   ;;  %p1429_p13 = scmp.ne.s32.totalorder %s1802_s19, %s1428_s8  ;;  %p1436_p3 = scmp.lt.s32.totalorder %s1434_s15, %s1428_s8 }
  0x28   : > { %1237 = vmatpush3.bf16.msra.mxu0 %v1413_v18  ;;  %1338 = vmatpush3.bf16.msra.mxu1 %v1413_v18 }
  0x29   : > { %1238 = vmatprep.subr.bf16.mxu0 %v1414_v19  ;;  %1331 = vmatprep.subr.bf16.mxu1 %v1414_v19  ;;  %p1430_p0 = pnand %p1429_p13, %p1587_p4  ;;  %p1437_p5 = por %p1436_p3, %p1435_p2 }
  0x2b   : > { %937 = vperm.xlu1 %1399, %v875_v42   ;;  %932 = vperm.xlu0 %1398, %v874_v43   ;;  %v1747_v42 = vld [vmem:[%s1859_s4] ss:$0 sm:$0xff]  ;;  %p1431_p1 = pneg %p1430_p0 }
  0x2c   : > { %1239 = vmatpush3.bf16.msra.mxu0 %v1415_v20  ;;  %1339 = vmatpush3.bf16.msra.mxu1 %v1415_v20 }
  0x2d   : > { %1300 = vmatprep.subr.bf16.mxu1 %v1416_v23  ;;  %p1438_p6 = pnand %p1437_p5, %p1431_p1 }
  0x2f   : > { %519 = vmatmul.mubr.bf16.vlgmr.msra.gmra.mrb[0].mxu0 %v337_v24  ;;  %567 = vmatmul.mubr.bf16.vlgmr.msra.gmra.mrb[0].mxu1 %v349_v25 }
  0x30   : > { %1301 = vmatpush3.bf16.msra.mxu1 %v1416_v23  ;;  %526 = vmatprep.mubr.bf16.mxu0 %v340_v27 }
  0x31   : > { %1302 = vmatprep.subr.bf16.mxu1 %v1417_v30  ;;  %574 = vmatprep.mubr.bf16.mxu1 %v352_v29 }
  0x32   : > { %947 = vperm.xlu1 %1399, %v877_v47   ;;  %942 = vperm.xlu0 %1398, %v876_v48  }
  0x34   : > { %1303 = vmatpush3.bf16.msra.mxu1 %v1417_v30 }
  0x35   : > { %1304 = vmatprep.subr.bf16.mxu1 %v1418_v33 }
  0x36   : > { %957 = vperm.xlu1 %1399, %v879_v51   ;;  %952 = vperm.xlu0 %1398, %v878_v52  }
  0x37   : > { %527 = vmatmul.mubr.bf16.gmra.mrb[4].mxu0 %v339_v35  ;;  %575 = vmatmul.mubr.bf16.gmra.mrb[4].mxu1 %v351_v36 }
  0x38   : > { %1305 = vmatpush3.bf16.msra.mxu1 %v1418_v33  ;;  %534 = vmatprep.mubr.bf16.mxu0 %v342_v39 }
  0x39   : > { %1306 = vmatprep.subr.bf16.mxu1 %v1419_v40  ;;  %1308 = vmatprep.mubr.msk.bf16.mxu1 %vm746_vm0, %v1420_v41 }
  0x3a   : > { %967 = vperm.xlu1 %1399, %v881_v56   ;;  %962 = vperm.xlu0 %1398, %v880_v57  }
  0x3c   : > { %1307 = vmatpush3.bf16.msra.mxu1 %v1419_v40 }
  0x3e   : > { %977 = vperm.xlu1 %1399, %v883_v60   ;;  %972 = vperm.xlu0 %1398, %v882_v61  }
  0x3f   : > { %535 = vmatmul.mubr.bf16.gmra.mrb[8].mxu0 %v341_v45  ;;  %1309 = vmatmul.mubr.msk.bf16.vlgmr.msra.gmra.mrb[8].mxu1 %vm746_vm0, %v1421_v46 }
  0x40   : > { %542 = vmatprep.mubr.bf16.mxu0 %v344_v49  ;;  %1312 = vmatprep.mubr.msk.bf16.mxu1 %vm746_vm0, %v1422_v50 }
  0x47   : > { %543 = vmatmul.mubr.bf16.gmra.mrb[12].mxu0 %v343_v54  ;;  %1313 = vmatmul.mubr.msk.bf16.gmra.mrb[12].mxu1 %vm746_vm0, %v1423_v55 }
  0x48   : > { %550 = vmatprep.mubr.bf16.mxu0 %v346_v58  ;;  %1316 = vmatprep.mubr.msk.bf16.mxu1 %vm746_vm0, %v1424_v59 }
  0x4f   : > { %551 = vmatmul.mubr.bf16.gmra.mrb[16].mxu0 %v345_v63  ;;  %1317 = vmatmul.mubr.msk.bf16.gmra.mrb[16].mxu1 %vm746_vm0, %v1425_v0 }
  0x50   : > { %558 = vmatprep.mubr.bf16.mxu0 %v348_v1  ;;  %1320 = vmatprep.mubr.msk.bf16.mxu1 %vm746_vm0, %v1426_v2 }
  0x57   : > { %559 = vmatmul.mubr.bf16.gmra.mrb[20].mxu0 %v347_v3  ;;  %1321 = vmatmul.mubr.msk.bf16.gmra.mrb[20].mxu1 %vm746_vm0, %v1427_v4 }
  0x9e   : > { %v913_v5 = vpop.permute.xlu1 %912  ;;  %v903_v6 = vpop.permute.xlu0 %902 }
  0xa2   : > { %v918_v7 = vpop.permute.xlu1 %917  ;;  %v908_v8 = vpop.permute.xlu0 %907 }
  0xa6   : > { %v1723_v9 = vpop.permute.xlu1 %927  ;;  %v1725_v10 = vpop.permute.xlu0 %922 }
  0xaa   : > { %v1731_v23 = vpop.permute.xlu1 %937  ;;  %v933_v24 = vpop.permute.xlu0 %932 }
  0xb1   : > { %v1738_v37 = vpop.permute.xlu1 %947  ;;  %v1740_v38 = vpop.permute.xlu0 %942 }
  0xb5   : > { %v1757_v62 = vpop.permute.xlu1 %957  ;;  %v1759_v63 = vpop.permute.xlu0 %952 }
 0x102   : > { %v1240_v11 = vpop.f32.mrb[0].mxu0  ;;  %v1276_v12 = vpop.f32.mrb[0].mxu1 }
 0x103   : > { %v1241_v13 = vpop.f32.mrb[1].mxu0  ;;  %v1277_v14 = vpop.f32.mrb[1].mxu1 }
 0x104   : > { %v1242_v15 = vadd.f32 %v1241_v13, %v1240_v11  ;;  %v1243_v16 = vpop.f32.mrb[2].mxu0  ;;  %v1727_v17 = vadd.f32 %v1277_v14, %v1276_v12  ;;  %v1279_v18 = vpop.f32.mrb[2].mxu1 }
 0x105   : > { %v1244_v19 = vpop.f32.mrb[3].mxu0  ;;  %v1280_v20 = vpop.f32.mrb[3].mxu1 }
 0x106   : > { %v1245_v21 = vadd.f32 %v1244_v19, %v1243_v16  ;;  %v1729_v22 = vadd.f32 %v1280_v20, %v1279_v18  ;;  %v980_v43 = vmul.f32 %v1242_v15, %v903_v6 }
 0x108   : > { %v981_v52 = vmul.f32 %v1245_v21, %v908_v8  ;;  %v968_v21 = vpop.permute.xlu1 %967 }
 0x10a   : > { %v1246_v25 = vpop.f32.mrb[4].mxu0  ;;  %v1282_v26 = vpop.f32.mrb[4].mxu1 }
 0x10b   : > { %v1247_v27 = vpop.f32.mrb[5].mxu0  ;;  %v1283_v28 = vpop.f32.mrb[5].mxu1 }
 0x10c   : > { %v1248_v29 = vadd.f32 %v1247_v27, %v1246_v25  ;;  %v1249_v30 = vpop.f32.mrb[6].mxu0  ;;  %v1733_v31 = vadd.f32 %v1283_v28, %v1282_v26  ;;  %v1285_v32 = vpop.f32.mrb[6].mxu1 }
 0x10d   : > { %v1250_v33 = vpop.f32.mrb[7].mxu0  ;;  %v1286_v34 = vpop.f32.mrb[7].mxu1 }
 0x10e   : > { %v1251_v35 = vadd.f32 %v1250_v33, %v1249_v30  ;;  %v1735_v36 = vadd.f32 %v1286_v34, %v1285_v32  ;;  %v982_v39 = vmul.f32 %v1248_v29, %v913_v5  ;;  %v963_v25 = vpop.permute.xlu0 %962 }
 0x110   : > { %v983_v47 = vmul.f32 %v1251_v35, %v918_v7 }
 0x112   : > { %v1252_v40 = vpop.f32.mrb[8].mxu0  ;;  %v1310_v41 = vpop.f32.mrb[8].mxu1 }
 0x113   : > { %v998_v44 = vadd.f32 %v1310_v41, %v982_v39  ;;  %v1253_v45 = vpop.f32.mrb[9].mxu0  ;;  %v805_v46 = vpop.f32.mrb[9].mxu1 }
 0x114   : > { %v1254_v48 = vadd.f32 %v1253_v45, %v1252_v40  ;;  %v996_v49 = vadd.f32 %v980_v43, %v805_v46  ;;  %v1255_v50 = vpop.f32.mrb[10].mxu0  ;;  %v1311_v51 = vpop.f32.mrb[10].mxu1 }
 0x115   : > { %v1021_v53 = vadd.f32 %v1747_v42, %v998_v44  ;;  %v999_v54 = vadd.f32 %v1311_v51, %v983_v47  ;;  %v1256_v55 = vpop.f32.mrb[11].mxu0  ;;  %v808_v56 = vpop.f32.mrb[11].mxu1  ;;  %v992_v47 = vmul.f32 %v1727_v17, %v963_v25 }
 0x116   : > { %v1019_v57 = vadd.f32 %v1747_v42, %v996_v49  ;;  %v1257_v58 = vadd.f32 %v1256_v55, %v1255_v50  ;;  %v997_v59 = vadd.f32 %v981_v52, %v808_v56  ;;  %v984_v2 = vmul.f32 %v1254_v48, %v1725_v10  ;;  %v973_v39 = vpop.permute.xlu0 %972  ;;  %v978_v43 = vpop.permute.xlu1 %977 }
 0x117   : > { %1037 = vst [vmem:[%s1751_s17 + $0x10] sm:$0xff] %v1021_v53  ;;  %v1022_v60 = vadd.f32 %v1747_v42, %v999_v54  ;;  %v994_v46 = vmul.f32 %v1733_v31, %v973_v39  ;;  %v995_v52 = vmul.f32 %v1735_v36, %v978_v43  ;;  %v993_v55 = vmul.f32 %v1729_v22, %v968_v21 }
 0x118   : > { %1035 = vst [vmem:[%s1751_s17] sm:$0xff] %v1019_v57  ;;  %v1020_v61 = vadd.f32 %v1747_v42, %v997_v59  ;;  %v985_v11 = vmul.f32 %v1257_v58, %v1723_v9 }
 0x119   : > { %1038 = vst [vmem:[%s1751_s17 + $0x18] sm:$0xff] %v1022_v60 }
 0x11a   : > { %1036 = vst [vmem:[%s1751_s17 + $0x8] sm:$0xff] %v1020_v61  ;;  %v1258_v0 = vpop.f32.mrb[12].mxu0  ;;  %v1314_v1 = vpop.f32.mrb[12].mxu1 }
 0x11b   : > { %v1259_v3 = vpop.f32.mrb[13].mxu0  ;;  %v821_v4 = vpop.f32.mrb[13].mxu1 }
 0x11c   : > { %v1260_v5 = vadd.f32 %v1259_v3, %v1258_v0  ;;  %v1000_v6 = vadd.f32 %v984_v2, %v821_v4  ;;  %v1261_v7 = vpop.f32.mrb[14].mxu0  ;;  %v1315_v8 = vpop.f32.mrb[14].mxu1 }
 0x11d   : > { %v1262_v12 = vpop.f32.mrb[15].mxu0  ;;  %v824_v13 = vpop.f32.mrb[15].mxu1 }
 0x11e   : > { %v986_v14 = vmul.f32 %v1260_v5, %v933_v24  ;;  %v1023_v15 = vadd.f32 %v1747_v42, %v1000_v6  ;;  %v1263_v16 = vadd.f32 %v1262_v12, %v1261_v7  ;;  %v1001_v18 = vadd.f32 %v985_v11, %v824_v13 }
 0x120   : > { %v1002_v19 = vadd.f32 %v1314_v1, %v986_v14  ;;  %1039 = vst [vmem:[%s1751_s17 + $0x20] sm:$0xff] %v1023_v15  ;;  %v987_v10 = vmul.f32 %v1263_v16, %v1731_v23  ;;  %v1024_v20 = vadd.f32 %v1747_v42, %v1001_v18 }
 0x122   : > { %v1025_v26 = vadd.f32 %v1747_v42, %v1002_v19  ;;  %v1003_v9 = vadd.f32 %v1315_v8, %v987_v10  ;;  %1040 = vst [vmem:[%s1751_s17 + $0x28] sm:$0xff] %v1024_v20  ;;  %v1264_v27 = vpop.f32.mrb[16].mxu0  ;;  %v1318_v24 = vpop.f32.mrb[16].mxu1 }
 0x123   : > { %v1265_v28 = vpop.f32.mrb[17].mxu0  ;;  %v837_v29 = vpop.f32.mrb[17].mxu1 }
 0x124   : > { %1041 = vst [vmem:[%s1751_s17 + $0x30] sm:$0xff] %v1025_v26  ;;  %v1026_v30 = vadd.f32 %v1747_v42, %v1003_v9  ;;  %v1266_v32 = vadd.f32 %v1265_v28, %v1264_v27  ;;  %v1267_v33 = vpop.f32.mrb[18].mxu0  ;;  %v1319_v34 = vpop.f32.mrb[18].mxu1 }
 0x125   : > { %v1268_v23 = vpop.f32.mrb[19].mxu0  ;;  %v840_v35 = vpop.f32.mrb[19].mxu1 }
 0x126   : > { %1042 = vst [vmem:[%s1751_s17 + $0x38] sm:$0xff] %v1026_v30  ;;  %v988_v40 = vmul.f32 %v1266_v32, %v1740_v38  ;;  %v1269_v41 = vadd.f32 %v1268_v23, %v1267_v33 }
 0x128   : > { %v1004_v44 = vadd.f32 %v988_v40, %v837_v29  ;;  %v989_v45 = vmul.f32 %v1269_v41, %v1738_v37 }
 0x12a   : > { %v1027_v48 = vadd.f32 %v1747_v42, %v1004_v44  ;;  %v1005_v49 = vadd.f32 %v989_v45, %v840_v35  ;;  %v1270_v50 = vpop.f32.mrb[20].mxu0  ;;  %v1322_v51 = vpop.f32.mrb[20].mxu1 }
 0x12b   : > { %v1010_v53 = vadd.f32 %v1322_v51, %v994_v46  ;;  %v1271_v38 = vpop.f32.mrb[21].mxu0  ;;  %v853_v54 = vpop.f32.mrb[21].mxu1 }
 0x12c   : > { %1043 = vst [vmem:[%s1751_s17 + $0x40] sm:$0xff] %v1027_v48  ;;  %v1028_v37 = vadd.f32 %v1747_v42, %v1005_v49  ;;  %v1272_v31 = vadd.f32 %v1271_v38, %v1270_v50  ;;  %v1008_v17 = vadd.f32 %v992_v47, %v853_v54  ;;  %v1273_v56 = vpop.f32.mrb[22].mxu0  ;;  %v1323_v57 = vpop.f32.mrb[22].mxu1 }
 0x12d   : > { %v1033_v58 = vadd.f32 %v1747_v42, %v1010_v53  ;;  %v1011_v59 = vadd.f32 %v1323_v57, %v995_v52  ;;  %v1274_v36 = vpop.f32.mrb[23].mxu0  ;;  %v856_v60 = vpop.f32.mrb[23].mxu1 }
 0x12e   : > { %1044 = vst [vmem:[%s1751_s17 + $0x48] sm:$0xff] %v1028_v37  ;;  %v990_v22 = vmul.f32 %v1272_v31, %v1759_v63  ;;  %v1031_v61 = vadd.f32 %v1747_v42, %v1008_v17  ;;  %v1275_v0 = vadd.f32 %v1274_v36, %v1273_v56  ;;  %v1009_v1 = vadd.f32 %v993_v55, %v856_v60 }
 0x12f   : > { %1049 = vst [vmem:[%s1751_s17 + $0x70] sm:$0xff] %v1033_v58  ;;  %v1034_v2 = vadd.f32 %v1747_v42, %v1011_v59 }
 0x130   : > { %v1006_v3 = vadd.f32 %v1318_v24, %v990_v22  ;;  %1047 = vst [vmem:[%s1751_s17 + $0x60] sm:$0xff] %v1031_v61  ;;  %v991_v4 = vmul.f32 %v1275_v0, %v1757_v62  ;;  %v1032_v5 = vadd.f32 %v1747_v42, %v1009_v1 }
 0x131   : > { %1050 = vst [vmem:[%s1751_s17 + $0x78] sm:$0xff] %v1034_v2 }
 0x132   : > { %v1029_v63 = vadd.f32 %v1747_v42, %v1006_v3  ;;  %v1007_v6 = vadd.f32 %v1319_v34, %v991_v4  ;;  %1048 = vst [vmem:[%s1751_s17 + $0x68] sm:$0xff] %v1032_v5 }
 0x134   : > { %1045 = vst [vmem:[%s1751_s17 + $0x50] sm:$0xff] %v1029_v63  ;;  %v1030_v62 = vadd.f32 %v1747_v42, %v1007_v6 }
 0x136   : > { %1046 = vst [vmem:[%s1751_s17 + $0x58] sm:$0xff] %v1030_v62 }
 0x137   : > { %1441 = shalt.err (!%p1438_p6)
}
 0x138   : > { %s1442_s13 = scalar_lea.hbm %s1800_s30, 2048  ;;  %s1446_s12 = scalar_lea.hbm %s1861_s6, 4096 }
 0x139   : > { %p1443_p7 = scmp.ne.s32.totalorder %s1800_s30, %s1442_s13  ;;  %p1447_p11 = scmp.lt.u32.totalorder %s1800_s30, %s1861_s6 }
 0x13a   : > { %p1448_p12 = scmp.lt.u32.totalorder %s1446_s12, %s1442_s13  ;;  %p1450_p0 = scmp.lt.u32.totalorder %s1442_s13, %s1800_s30 }
 0x13b   : > { %p1444_p9 = pnand %p1443_p7, %p1587_p4 }
 0x13c   : > { %p1449_p13 = por %p1448_p12, %p1447_p11 }
 0x13d   : > { %p1445_p10 = pneg %p1444_p9 }
 0x13e   : > { %p1451_p1 = por %p1450_p0, %p1449_p13 }
 0x140   : > { %p1452_p2 = pnand %p1451_p1, %p1445_p10 }
 0x142   : > { %1455 = shalt.err (!%p1452_p2)
}
 0x143   : > { %s1510_s27 = smov 128   ;;  %s1511_s28 = smov 8  }
 0x144   : > { %1340 = dma.vmem_to_hbm [thread:$0]  (%p1587_p4), %s1802_s19, 2048, %s1800_s30, %s1809_s24, %s1510_s27, %s1510_s27, %s1511_s28  }
 0x145 PF: > { %p1346_p3 = scmp.ge.s32.totalorder %s1506_s26, 2  ;;  %s1080_s8 = sand.u32 1, %s1486_s21  }
 0x146   : > { %s1081_s11 = scalar_lea.sflag [#allocation4], %s1080_s8 }
 0x147   : > { %p1343_p5 = pnand %p1346_p3, %p1594_p8 }
 0x149   : > { %1481 = dma.done.wait (!%p1343_p5), %s1081_s11, 2048  }
 0x14a   : > { %1483 = vsyncadd (!%p1343_p5), %s1081_s11, 4294965248  ;;  %s19_s26 = sadd.s32 1, %s1506_s26   ;;  %s1864_s21 = smov %s1490_s22 }
 0x14b   : > { %p16_p6 = scmp.ge.s32.totalorder %s19_s26, 4   ;;  %s1865_s22 = smov %s1494_s23 }
 0x14c   : > { %s1866_s23 = smov %s1600_s10  ;;  %s1867_s24 = smov %s1502_s25 }
 0x14d   : > { %s1868_s25 = smov %s1870_s29  ;;  %18 = sbr.rel (!%p16_p6) target bundleno = 4 (0x4), region = 98 }
 0x154   :  { %1086 = vsyncpa [#allocation4], 1 }
 0x155   :  { %1088 = vsyncpa [#allocation4 + $0x1], 1 }

</bundles_post_ra>
